<compile_context>
chip_gen: v6e
topology: v6e:2x2x1
jax: 0.10.0
libtpu: 0.0.40
codegen_flags: <defaults>
</compile_context>

<pallas_src>
import functools

import jax
import jax.numpy as jnp
from jax.experimental import pallas as pl
from jax.experimental.pallas import tpu as pltpu

KERNEL_SIZES = (1, 2, 3, 5)
NUM_FILTERS = 36
KMAX = max(KERNEL_SIZES)


def _round_up(x, m):
    return (x + m - 1) // m * m


# --------------------------------------------------------------------------- #
# Kernel
# --------------------------------------------------------------------------- #
def _cnn_kernel(emb_ref, w_all_ref, b_all_ref, vlen_ref, wl_ref, bl_ref, out_ref,
                *, kmax):
    TB, L_src, E = emb_ref.shape
    T = L_src - kmax + 1                      # padded time length (multiple of 8)
    K_pad, F_pad = w_all_ref.shape

    # im2col unfold built directly in bf16 (no f32 round trip): tap k contributes
    # rows emb[:, k:k+T, :], lane-concatenated, then zero-padded to the
    # MXU-aligned contraction depth K_pad.
    emb = emb_ref[...]                                               # (TB, L_src, E) bf16
    taps = [emb[:, k:k + T, :].reshape(TB * T, E) for k in range(kmax)]
    x_unf = jnp.concatenate(taps, axis=1)                            # (TB*T, kmax*E)
    if K_pad > kmax * E:
        x_unf = jnp.concatenate(
            [x_unf, jnp.zeros((TB * T, K_pad - kmax * E), x_unf.dtype)], axis=1)

    # Single fused MXU matmul covering all 4 conv branches and all taps.
    acc = jnp.dot(x_unf, w_all_ref[...],
                  preferred_element_type=jnp.float32)                # (TB*T, F_pad) f32
    acc = acc.reshape(TB, T, F_pad)

    # Mask invalid trailing time positions per branch on the PRE-activation value
    # (finite "-inf"), then global max-pool over time.  Bias-add and tanh are
    # hoisted past the monotonic max-pool: max_t tanh(a_t + b) == tanh(max_t a_t + b).
    t_iota = jax.lax.broadcasted_iota(jnp.int32, (T, F_pad), 0)
    valid = t_iota < vlen_ref[...]                                   # (T, F_pad)
    acc = jnp.where(valid, acc, jnp.float32(-1e30))
    pooled = jnp.max(acc, axis=1)                                    # (TB, F_pad) f32
    feats = jnp.tanh(pooled + b_all_ref[...])                        # one EUP pass

    # Dropout(p=0.7) is identity at inference.  Classifier matmul in bf16.
    logits = jnp.dot(feats.astype(jnp.bfloat16), wl_ref[...],
                     preferred_element_type=jnp.float32) + bl_ref[...]
    out_ref[...] = logits.astype(out_ref.dtype)                      # (TB, C_pad), lane dense


# --------------------------------------------------------------------------- #
# Parameter handling
# --------------------------------------------------------------------------- #
def init_params(key, num_classes, max_features, embedding_dim):
    """PyTorch-layout parameters (same layouts as nn.Embedding/Conv2d/Linear)."""
    F = NUM_FILTERS
    keys = jax.random.split(key, 3 + 2 * len(KERNEL_SIZES))
    params = {'embedding': jax.random.normal(
        keys[0], (max_features, embedding_dim), jnp.float32)}
    for i, K in enumerate(KERNEL_SIZES):
        params[f'conv{K}_w'] = jax.random.normal(
            keys[1 + 2 * i], (F, 1, K, embedding_dim), jnp.float32) * 0.1
        params[f'conv{K}_b'] = jax.random.normal(
            keys[2 + 2 * i], (F,), jnp.float32) * 0.1
    params['linear_w'] = jax.random.normal(
        keys[-2], (num_classes, len(KERNEL_SIZES) * F), jnp.float32) * 0.1
    params['linear_b'] = jax.random.normal(
        keys[-1], (num_classes,), jnp.float32) * 0.1
    return params


def pack_params(params):
    """Pack torch-layout params into fused, lane/contraction-padded kernel operands."""
    E = params['embedding'].shape[1]
    F = NUM_FILTERS
    kmax = KMAX
    F_used = len(KERNEL_SIZES) * F
    F_pad = _round_up(F_used, 128)
    K_pad = _round_up(kmax * E, 256)          # full-depth MXU pass on v6e/v7x
    C = params['linear_b'].shape[0]
    C_pad = _round_up(C, 128)

    w_all = jnp.zeros((K_pad, F_pad), jnp.float32)
    b_all = jnp.zeros((1, F_pad), jnp.float32)
    # Padded filter lanes behave like K=1 (zero weight, zero bias -> pooled 0).
    k_of_f = jnp.ones((1, F_pad), jnp.int32)
    for i, K in enumerate(KERNEL_SIZES):
        col = i * F
        wk = jnp.transpose(params[f'conv{K}_w'][:, 0, :, :], (1, 2, 0))  # (K, E, F)
        w_all = w_all.at[:K * E, col:col + F].set(wk.reshape(K * E, F))
        b_all = b_all.at[0, col:col + F].set(params[f'conv{K}_b'])
        k_of_f = k_of_f.at[0, col:col + F].set(K)

    wl = jnp.zeros((F_pad, C_pad), jnp.float32)
    wl = wl.at[:F_used, :C].set(params['linear_w'].T)
    bl = jnp.zeros((1, C_pad), jnp.float32)
    bl = bl.at[0, :C].set(params['linear_b'])

    return {
        'embedding': params['embedding'].astype(jnp.bfloat16),  # bf16 gather output
        'w_all': w_all.astype(jnp.bfloat16),                    # (K_pad, F_pad) bf16
        'b_all': b_all,                                         # (1, F_pad) f32
        'k_of_f': k_of_f,                                       # (1, F_pad) i32
        'linear_w': wl.astype(jnp.bfloat16),                    # (F_pad, C_pad) bf16
        'linear_b': bl,                                         # (1, C_pad) f32
        'num_classes': C,
    }


# --------------------------------------------------------------------------- #
# Generation-aware tile sizing
# --------------------------------------------------------------------------- #
def _vmem_budget():
    """Per-step VMEM budget and explicit compiler limit, derived from hardware."""
    try:
        cap = int(pltpu.get_tpu_info().vmem_capacity_bytes)
    except Exception:
        cap = 128 << 20
    budget = cap * 3 // 8     # ~24 MiB on v7x (64 MiB VMEM), ~48 MiB on v5e/v6e (128 MiB)
    limit = cap * 3 // 4      # explicit scoped-VMEM limit, leaves headroom
    return budget, limit


def _choose_tb(B, T, per_b, fixed, budget):
    """Batch tile: as large as VMEM allows, >= the MXU-fill target TB*T >= 512
    when possible, and capped so the grid has >= 2 steps (v7x megacore) whenever
    that still meets the MXU target."""
    b_pad = _round_up(B, 8)
    tb_vmem = max(8, ((budget - fixed) // max(per_b, 1)) // 8 * 8)
    tb = min(b_pad, tb_vmem)
    tb_mxu = _round_up(-(-512 // T), 8)          # ceil(512 / T), mult of 8
    tb_half = _round_up(-(-b_pad // 2), 8)       # >= 2 grid steps
    if tb_half >= tb_mxu:
        tb = min(tb, tb_half)
    return int(max(8, tb))


# --------------------------------------------------------------------------- #
# Forward
# --------------------------------------------------------------------------- #
def cnn_forward(token_ids, packed):
    # TODO(synk): move this gather into the kernel (scalar-prefetch token ids +
    # per-row DMA) to eliminate the HBM round trip of the (B, L_src, E) tensor.
    emb = packed['embedding'][token_ids]                 # (B, L, E) bf16 gather
    B, L, E = emb.shape
    kmax = KMAX
    assert L >= kmax, "sequence length must be >= max kernel size (5)"

    T = _round_up(L, 8)                                  # common padded time length
    L_src = T + kmax - 1                                 # rows needed by the unfold
    K_pad, F_pad = packed['w_all'].shape
    C_pad = packed['linear_w'].shape[1]
    C = packed['num_classes']
    vlen = (L + 1 - packed['k_of_f']).astype(jnp.int32)  # valid conv length per lane

    # Per-batch-row VMEM working set (bytes) + fixed resident-weight cost.
    per_b = (2 * L_src * E * 2          # double-buffered bf16 emb tile
             + kmax * T * E * 2         # bf16 tap slices
             + T * K_pad * 2            # bf16 unfolded GEMM operand
             + 2 * T * F_pad * 4        # f32 conv accumulator + masked copy
             + 2 * C_pad * 4)           # double-buffered output block
    fixed = (2 * (K_pad * F_pad + F_pad * C_pad) * 2    # resident bf16 weights (x2 buf)
             + 4 * F_pad * 4 + 4 * C_pad * 4)           # biases / valid-length rows
    budget, vmem_limit = _vmem_budget()
    TB = _choose_tb(B, T, per_b, fixed, budget)

    grid_b = -(-B // TB)
    B_pad = grid_b * TB
    # Zero-pad batch and time so every grid step reads a fully in-bounds block.
    emb = jnp.pad(emb, ((0, B_pad - B), (0, L_src - L), (0, 0)))

    out_padded = pl.pallas_call(
        functools.partial(_cnn_kernel, kmax=kmax),
        out_shape=jax.ShapeDtypeStruct((B_pad, C_pad), jnp.float32),
        grid=(grid_b,),
        in_specs=[
            pl.BlockSpec((TB, L_src, E), lambda i: (i, 0, 0)),      # emb tile
            pl.BlockSpec((K_pad, F_pad), lambda i: (0, 0)),         # fused conv W (bf16)
            pl.BlockSpec((1, F_pad), lambda i: (0, 0)),             # fused conv b (f32)
            pl.BlockSpec((1, F_pad), lambda i: (0, 0)),             # valid lengths (i32)
            pl.BlockSpec((F_pad, C_pad), lambda i: (0, 0)),         # linear W (bf16)
            pl.BlockSpec((1, C_pad), lambda i: (0, 0)),             # linear b (f32)
        ],
        out_specs=pl.BlockSpec((TB, C_pad), lambda i: (i, 0)),
        compiler_params=pltpu.CompilerParams(
            dimension_semantics=("parallel",),
            vmem_limit_bytes=int(vmem_limit)),
    )(emb, packed['w_all'], packed['b_all'], vlen,
      packed['linear_w'], packed['linear_b'])

    return out_padded[:B, :C]                            # drop batch/class padding


# --------------------------------------------------------------------------- #
# Pure-JAX reference (f32, PyTorch semantics) for correctness checking
# --------------------------------------------------------------------------- #
def cnn_forward_reference(token_ids, params):
    emb = params['embedding'][token_ids].astype(jnp.float32)        # (B, L, E)
    L = emb.shape[1]
    feats = []
    for K in KERNEL_SIZES:
        w = params[f'conv{K}_w'][:, 0, :, :]                        # (F, K, E)
        b = params[f'conv{K}_b']
        T = L - K + 1
        windows = jnp.stack([emb[:, t:t + K, :] for t in range(T)], axis=1)
        conv = jnp.einsum('btke,fke->btf', windows, w, precision='highest') + b
        feats.append(jnp.max(jnp.tanh(conv), axis=1))               # (B, F)
    feats = jnp.concatenate(feats, axis=1)                          # (B, 4F)
    return jnp.einsum('bf,cf->bc', feats, params['linear_w'],
                      precision='highest') + params['linear_b']


if __name__ == "__main__":
    # Small shapes consistent with the module.
    B, L = 2, 8                 # batch, sequence length (>= max kernel size 5)
    max_features = 50           # vocab size
    embedding_dim = 32
    num_classes = 5

    key = jax.random.PRNGKey(0)
    k_tok, k_par = jax.random.split(key)
    token_ids = jax.random.randint(k_tok, (B, L), 0, max_features, dtype=jnp.int32)
    params = init_params(k_par, num_classes, max_features, embedding_dim)
    packed = pack_params(params)

    out = cnn_forward(token_ids, packed)
    jax.block_until_ready(out)
    assert out.shape == (B, num_classes)

    ref = cnn_forward_reference(token_ids, params)
    assert bool(jnp.all(jnp.isfinite(out)))
    assert bool(jnp.allclose(out, ref, atol=5e-2, rtol=5e-2)), (out, ref)

    print("KERNEL_OK")
</pallas_src>

<mosaic_0001>
module attributes {stable_mosaic.version = 11 : i64} {
  func.func @_cnn_kernel(%arg0: i32, %arg1: memref<8x12x32xbf16, #tpu.memory_space<vmem>>, %arg2: memref<256x256xbf16, #tpu.memory_space<vmem>>, %arg3: memref<1x256xf32, #tpu.memory_space<vmem>>, %arg4: memref<1x256xi32, #tpu.memory_space<vmem>>, %arg5: memref<256x128xbf16, #tpu.memory_space<vmem>>, %arg6: memref<1x128xf32, #tpu.memory_space<vmem>>, %arg7: memref<8x128xf32, #tpu.memory_space<vmem>>) attributes {dimension_semantics = [#tpu.dimension_semantics<parallel>], iteration_bounds = array<i64: 1>, scalar_prefetch = 0 : i64, scratch_operands = 0 : i64, tpu.core_type = #tpu.core_type<tc>, window_params = [{transform_indices = @transform_0, window_bounds = array<i64: 8, 12, 32>}, {pipeline_mode = #tpu.pipeline_mode<synchronous>, transform_indices = @transform_1, window_bounds = array<i64: 256, 256>}, {pipeline_mode = #tpu.pipeline_mode<synchronous>, transform_indices = @transform_2, window_bounds = array<i64: 1, 256>}, {pipeline_mode = #tpu.pipeline_mode<synchronous>, transform_indices = @transform_3, window_bounds = array<i64: 1, 256>}, {pipeline_mode = #tpu.pipeline_mode<synchronous>, transform_indices = @transform_4, window_bounds = array<i64: 256, 128>}, {pipeline_mode = #tpu.pipeline_mode<synchronous>, transform_indices = @transform_5, window_bounds = array<i64: 1, 128>}, {transform_indices = @transform_6, window_bounds = array<i64: 8, 128>}]} {
    %c0 = arith.constant 0 : index
    %c0_0 = arith.constant 0 : index
    %c0_1 = arith.constant 0 : index
    %0 = vector.load %arg1[%c0, %c0_0, %c0_1] : memref<8x12x32xbf16, #tpu.memory_space<vmem>>, vector<8x12x32xbf16>
    %1 = vector.extract_strided_slice %0 {offsets = [0, 0, 0], sizes = [8, 8, 32], strides = [1, 1, 1]} : vector<8x12x32xbf16> to vector<8x8x32xbf16>
    %2 = vector.shape_cast %1 : vector<8x8x32xbf16> to vector<64x32xbf16>
    %3 = vector.extract_strided_slice %0 {offsets = [0, 1, 0], sizes = [8, 8, 32], strides = [1, 1, 1]} : vector<8x12x32xbf16> to vector<8x8x32xbf16>
    %4 = vector.shape_cast %3 : vector<8x8x32xbf16> to vector<64x32xbf16>
    %5 = vector.extract_strided_slice %0 {offsets = [0, 2, 0], sizes = [8, 8, 32], strides = [1, 1, 1]} : vector<8x12x32xbf16> to vector<8x8x32xbf16>
    %6 = vector.shape_cast %5 : vector<8x8x32xbf16> to vector<64x32xbf16>
    %7 = vector.extract_strided_slice %0 {offsets = [0, 3, 0], sizes = [8, 8, 32], strides = [1, 1, 1]} : vector<8x12x32xbf16> to vector<8x8x32xbf16>
    %8 = vector.shape_cast %7 : vector<8x8x32xbf16> to vector<64x32xbf16>
    %9 = vector.extract_strided_slice %0 {offsets = [0, 4, 0], sizes = [8, 8, 32], strides = [1, 1, 1]} : vector<8x12x32xbf16> to vector<8x8x32xbf16>
    %10 = vector.shape_cast %9 : vector<8x8x32xbf16> to vector<64x32xbf16>
    %11 = tpu.concatenate %2, %4, %6, %8, %10 in 1 : vector<64x32xbf16>, vector<64x32xbf16>, vector<64x32xbf16>, vector<64x32xbf16>, vector<64x32xbf16> -> vector<64x160xbf16>
    %cst = arith.constant 0.000000e+00 : bf16
    %12 = vector.broadcast %cst : bf16 to vector<64x96xbf16>
    %13 = tpu.concatenate %11, %12 in 1 : vector<64x160xbf16>, vector<64x96xbf16> -> vector<64x256xbf16>
    %c0_2 = arith.constant 0 : index
    %c0_3 = arith.constant 0 : index
    %14 = vector.load %arg2[%c0_2, %c0_3] : memref<256x256xbf16, #tpu.memory_space<vmem>>, vector<256x256xbf16>
    %cst_4 = arith.constant dense<0.000000e+00> : vector<64x256xf32>
    %15 = tpu.matmul %13, %14, %cst_4 {dimension_numbers = #tpu.dot_dimension_numbers<[1], [0], [0], [1], [0, 0, 1, 1], [], []>} : vector<64x256xbf16>, vector<256x256xbf16>, vector<64x256xf32> -> vector<64x256xf32>
    %16 = vector.shape_cast %15 : vector<64x256xf32> to vector<8x8x256xf32>
    %17 = tpu.iota {dimensions = array<i32: 0>} : vector<8x256xi32>
    %c0_5 = arith.constant 0 : index
    %c0_6 = arith.constant 0 : index
    %18 = vector.load %arg4[%c0_5, %c0_6] : memref<1x256xi32, #tpu.memory_space<vmem>>, vector<1x256xi32>
    %19 = vector.broadcast %18 : vector<1x256xi32> to vector<8x256xi32>
    %20 = arith.cmpi slt, %17, %19 : vector<8x256xi32>
    %cst_7 = arith.constant -1.000000e+30 : f32
    %21 = vector.shape_cast %20 : vector<8x256xi1> to vector<1x8x256xi1>
    %22 = vector.broadcast %21 : vector<1x8x256xi1> to vector<8x8x256xi1>
    %23 = vector.broadcast %cst_7 : f32 to vector<8x8x256xf32>
    %24 = arith.select %22, %16, %23 : vector<8x8x256xi1>, vector<8x8x256xf32>
    %cst_8 = arith.constant dense<0xFF800000> : vector<8x256xf32>
    %25 = vector.multi_reduction <maximumf>, %24, %cst_8 [1] : vector<8x8x256xf32> to vector<8x256xf32>
    %c0_9 = arith.constant 0 : index
    %c0_10 = arith.constant 0 : index
    %26 = vector.load %arg3[%c0_9, %c0_10] : memref<1x256xf32, #tpu.memory_space<vmem>>, vector<1x256xf32>
    %27 = vector.broadcast %26 : vector<1x256xf32> to vector<8x256xf32>
    %28 = arith.addf %25, %27 : vector<8x256xf32>
    %29 = math.tanh %28 : vector<8x256xf32>
    %30 = arith.truncf %29 : vector<8x256xf32> to vector<8x256xbf16>
    %c0_11 = arith.constant 0 : index
    %c0_12 = arith.constant 0 : index
    %31 = vector.load %arg5[%c0_11, %c0_12] : memref<256x128xbf16, #tpu.memory_space<vmem>>, vector<256x128xbf16>
    %cst_13 = arith.constant dense<0.000000e+00> : vector<8x128xf32>
    %32 = tpu.matmul %30, %31, %cst_13 {dimension_numbers = #tpu.dot_dimension_numbers<[1], [0], [0], [1], [0, 0, 1, 1], [], []>} : vector<8x256xbf16>, vector<256x128xbf16>, vector<8x128xf32> -> vector<8x128xf32>
    %c0_14 = arith.constant 0 : index
    %c0_15 = arith.constant 0 : index
    %33 = vector.load %arg6[%c0_14, %c0_15] : memref<1x128xf32, #tpu.memory_space<vmem>>, vector<1x128xf32>
    %34 = vector.broadcast %33 : vector<1x128xf32> to vector<8x128xf32>
    %35 = arith.addf %32, %34 : vector<8x128xf32>
    %c0_16 = arith.constant 0 : index
    %c0_17 = arith.constant 0 : index
    %36 = vector.load %arg7[%c0_16, %c0_17] : memref<8x128xf32, #tpu.memory_space<vmem>>, vector<8x128xf32>
    tpu.vector_store %arg7[%c0_16, %c0_17], %35 {strides = array<i32>} : memref<8x128xf32, #tpu.memory_space<vmem>>, vector<8x128xf32>,
    return
  }
  func.func @transform_0(%arg0: i32) -> (i32, i32, i32) {
    %c0_i32 = arith.constant 0 : i32
    %c0_i32_0 = arith.constant 0 : i32
    %c0_i32_1 = arith.constant 0 : i32
    return %arg0, %c0_i32, %c0_i32_0 : i32, i32, i32
  }
  func.func @transform_1(%arg0: i32) -> (i32, i32) {
    %c0_i32 = arith.constant 0 : i32
    %c0_i32_0 = arith.constant 0 : i32
    %c0_i32_1 = arith.constant 0 : i32
    return %c0_i32, %c0_i32_0 : i32, i32
  }
  func.func @transform_2(%arg0: i32) -> (i32, i32) {
    %c0_i32 = arith.constant 0 : i32
    %c0_i32_0 = arith.constant 0 : i32
    %c0_i32_1 = arith.constant 0 : i32
    return %c0_i32, %c0_i32_0 : i32, i32
  }
  func.func @transform_3(%arg0: i32) -> (i32, i32) {
    %c0_i32 = arith.constant 0 : i32
    %c0_i32_0 = arith.constant 0 : i32
    %c0_i32_1 = arith.constant 0 : i32
    return %c0_i32, %c0_i32_0 : i32, i32
  }
  func.func @transform_4(%arg0: i32) -> (i32, i32) {
    %c0_i32 = arith.constant 0 : i32
    %c0_i32_0 = arith.constant 0 : i32
    %c0_i32_1 = arith.constant 0 : i32
    return %c0_i32, %c0_i32_0 : i32, i32
  }
  func.func @transform_5(%arg0: i32) -> (i32, i32) {
    %c0_i32 = arith.constant 0 : i32
    %c0_i32_0 = arith.constant 0 : i32
    %c0_i32_1 = arith.constant 0 : i32
    return %c0_i32, %c0_i32_0 : i32, i32
  }
  func.func @transform_6(%arg0: i32) -> (i32, i32) {
    %c0_i32 = arith.constant 0 : i32
    %c0_i32_0 = arith.constant 0 : i32
    return %arg0, %c0_i32 : i32, i32
  }
}

</mosaic_0001>

<bundles_post_ra>
// kernel: tpu_custom_call.1
= control target key start
LH: loop header
LB: loop body
LE: loop exit
PB: predicated region body
PF: predicated region fallthrough
CT: control target
= control target key end

     0   :  { %11 = vsyncpa [#allocation3], 0  ;;  %s1904_s0 = inlined_call_operand.vmem [shape: bf16[8,12,32], index: 0, kind: input, shape index: {}]   ;;  %s1905_s1 = inlined_call_operand.hbm [shape: bf16[256,256], index: 1, kind: input, shape index: {}]   ;;  %s1906_s2 = inlined_call_operand.vmem [shape: f32[1,256], index: 2, kind: input, shape index: {}]   ;;  %s1907_s3 = inlined_call_operand.vmem [shape: s32[1,256], index: 3, kind: input, shape index: {}]   ;;  %s1908_s4 = inlined_call_operand.hbm [shape: bf16[256,128], index: 4, kind: input, shape index: {}]   ;;  %s1909_s5 = inlined_call_operand.vmem [shape: f32[1,128], index: 5, kind: input, shape index: {}]   ;;  %s1910_s6 = inlined_call_operand.hbm [shape: f32[8,128], index: 6, kind: output, shape index: {}]  }
   0x1   :  { %12 = vsyncpa [#allocation6], 0 }
   0x2   :  { %13 = vsyncpa [#allocation4], 0  ;;  %s1488_s21 = smov [#allocation2]  }
   0x3   :  { %s21_s22 = sshll.u32 %s1488_s21, 4  ;;  %s22_s22 = int_to_ptr.vmem [resolvable:$true] %s21_s22 }
   0x4   :  { %s1430_s23 = scalar_lea.vmem %s22_s22, 4096  ;;  %p1435_p1 = scmp.lt.s32.totalorder %s22_s22, %s22_s22 }
   0x5   :  { %p1431_p0 = scmp.ne.s32.totalorder %s22_s22, %s1430_s23  ;;  %p1436_p2 = scmp.lt.s32.totalorder %s1430_s23, %s1430_s23 }
   0x7   :  { %p1437_p3 = por %p1436_p2, %p1435_p1 }
   0x9   :  { %p1438_p4 = pnand %p1437_p3, %p1431_p0 }
   0xb   :  { %1441 = shalt.err (!%p1438_p4)
}
   0xc   :  { %s1489_s24 = smov 128   ;;  %s1490_s25 = smov 8  }
   0xd   :  { %27 = dma.hbm_to_vmem [thread:$0]  %s1905_s1, 4096, %s22_s22, [#allocation3], %s1489_s24, %s1489_s24, %s1490_s25  }
   0xe   :  { %s1491_s28 = smov [#allocation5]  }
   0xf   :  { %s37_s29 = sshll.u32 %s1491_s28, 4  ;;  %s38_s29 = int_to_ptr.vmem [resolvable:$true] %s37_s29 }
  0x10   :  { %s1450_s30 = scalar_lea.vmem %s38_s29, 2048  ;;  %p1455_p6 = scmp.lt.s32.totalorder %s38_s29, %s38_s29 }
  0x11   :  { %p1451_p5 = scmp.ne.s32.totalorder %s38_s29, %s1450_s30  ;;  %p1456_p7 = scmp.lt.s32.totalorder %s1450_s30, %s1450_s30 }
  0x13   :  { %p1457_p8 = por %p1456_p7, %p1455_p6 }
  0x15   :  { %p1458_p9 = pnand %p1457_p8, %p1451_p5 }
  0x17   :  { %1461 = shalt.err (!%p1458_p9)
}
  0x18   :  { %s1492_s7 = smov 64   ;;  %s1493_s8 = smov 4  }
  0x19   :  { %43 = dma.hbm_to_vmem [thread:$0]  %s1908_s4, 2048, %s38_s29, [#allocation6], %s1492_s7, %s1492_s7, %s1493_s8  }
  0x1a   :  { %1482 = dma.done.wait [#allocation3], 4096  }
  0x1b   :  { %1483 = vsyncadd [#allocation3], 4294963200 }
  0x1c   :  { %1484 = dma.done.wait [#allocation6], 2048  }
  0x1d   :  { %1485 = vsyncadd [#allocation6], 4294965248  ;;  %vm69_vm0 = vsmask.f32 3328  ;;  %vm70_vm1 = vsmask.f32 7440 }
  0x1e   :  { %vm235_vm2 = vsmask.f32 2304  ;;  %vm236_vm3 = vsmask.f32 6416  ;;  %vm200_vm4 = vcmask 1042432   ;;  %vm201_vm5 = vcmask 1046532   ;;  %vm1570_vm6 = vmor %vm69_vm0, %vm70_vm1 }
  0x1f   :  { %v1543_v0 = vld [vmem:[%s1904_s0] sm:$0xf]  ;;  %v1548_v1 = vld [vmem:[%s1904_s0 + $0x4] sm:$0x3]  ;;  %v1553_v2 = vld [vmem:[%s1904_s0 + $0x8] sm:$0xf] }
  0x20   :  { %v1558_v3 = vld [vmem:[%s1904_s0 + $0xc] sm:$0x3]  ;;  %v73_v4 = vshrl.u32 %v1543_v0, 16  ;;  %v76_v5 = vshll.u32 %v1543_v0, 16  ;;  %v82_v6 = vshll.u32 %v1548_v1, 16  ;;  %v87_v7 = vshrl.u32 %v1553_v2, 16  ;;  %vm1576_vm7 = vmor %vm235_vm2, %vm236_vm3 }
  0x21   :  { %v90_v8 = vshll.u32 %v1553_v2, 16  ;;  %v96_v9 = vshll.u32 %v1558_v3, 16  ;;  %v242_v10 = vshrl.u32 %v1548_v1, 16  ;;  %v252_v11 = vshrl.u32 %v1558_v3, 16  ;;  %vm1582_vm8 = vmor %vm200_vm4, %vm201_vm5  ;;  %v1591_v39 = vld [vmem:[%s1904_s0 + $0x10] sm:$0xf] }
  0x22   :  { %v75_v12 = vrot.slane %v73_v4, 4  ;;  %v78_v13 = vrot.slane %v76_v5, 5  ;;  %v84_v14 = vrot.slane %v82_v6, 5  ;;  %v89_v15 = vrot.slane %v87_v7, 4  ;;  %v1600_v44 = vld [vmem:[%s1904_s0 + $0x14] sm:$0x3] }
  0x23   :  { %v92_v16 = vrot.slane %v90_v8, 5  ;;  %v98_v17 = vrot.slane %v96_v9, 5  ;;  %v238_v18 = vrot.slane %v73_v4, 5  ;;  %v239_v19 = vrot.slane %v76_v5, 6  ;;  %v1605_v45 = vld [vmem:[%s1904_s0 + $0x18] sm:$0xf] }
  0x24   :  { %v79_v21 = vor.u32 %v78_v13, %v75_v12  ;;  %v244_v22 = vrot.slane %v242_v10, 5  ;;  %v245_v23 = vrot.slane %v82_v6, 6  ;;  %v248_v24 = vrot.slane %v87_v7, 5  ;;  %v1616_v50 = vld [vmem:[%s1904_s0 + $0x1c] sm:$0x3]  ;;  %s1494_s25 = smov 32  }
  0x25   :  { %v93_v25 = vor.u32 %v92_v16, %v89_v15  ;;  %v240_v27 = vor.u32 %v239_v19, %v238_v18  ;;  %v249_v28 = vrot.slane %v90_v8, 6  ;;  %v254_v29 = vrot.slane %v252_v11, 5  ;;  %v1322_v55 = vld [vmem:[#allocation2 + $0x74] ss:$8 sps:$4 sm:$0xff]   ;;  %v1324_v56 = vld [vmem:[#allocation2 + $0x70] ss:$8 sps:$4 sm:$0xff]  }
  0x26   :  { %v80_v30 = vrot.slane %v79_v21, 4  ;;  %v246_v31 = vor.u32 %v245_v23, %v244_v22  ;;  %v255_v32 = vrot.slane %v96_v9, 6  ;;  %v1202_v34 = vrot.slane %v1543_v0, 9  ;;  %v1325_v61 = vld [vmem:[#allocation2 + $0x64] ss:$8 sps:$4 sm:$0xff]   ;;  %677 = vmatprep.subr.bf16.mxu0 %v1322_v55  ;;  %s1495_s26 = smov 96  }
  0x27   :  { %v94_v35 = vrot.slane %v93_v25, 4  ;;  %v241_v36 = vrot.slane %v240_v27, 4  ;;  %v250_v37 = vor.u32 %v249_v28, %v248_v24  ;;  %v205_v38 = vrot.slane %v1548_v1, 5  ;;  %678 = vmatpush1.bf16.msra.mxu0 %v1324_v56  ;;  %v1327_v10 = vld [vmem:[#allocation2 + $0x60] ss:$8 sps:$4 sm:$0xff]   ;;  %s1496_s20 = smov [#allocation7]  }
  0x28   :  { %v85_v40 = vsel %vm1570_vm6, %v80_v30, %v84_v14  ;;  %v256_v41 = vor.u32 %v255_v32, %v254_v29  ;;  %v1203_v42 = vrot.slane %v1553_v2, 9  ;;  %v209_v43 = vrot.slane %v1558_v3, 5  ;;  %679 = vmatprep.subr.bf16.mxu0 %v1325_v61  ;;  %v1328_v15 = vld [vmem:[#allocation2 + $0x54] ss:$8 sps:$4 sm:$0xff]   ;;  %v1641_v25 = vld [vmem:[%s1904_s0 + $0x20] sm:$0xf] }
  0x29   :  { %v99_v46 = vsel %vm1570_vm6, %v94_v35, %v98_v17  ;;  %v247_v47 = vsel %vm1576_vm7, %v241_v36, %v246_v31  ;;  %v251_v48 = vrot.slane %v250_v37, 4  ;;  %v206_v49 = vsel %vm1582_vm8, %v1202_v34, %v205_v38  ;;  %v1648_v31 = vld [vmem:[%s1904_s0 + $0x24] sm:$0x3]  ;;  %v1330_v32 = vld [vmem:[#allocation2 + $0x50] ss:$8 sps:$4 sm:$0xff]   ;;  %s1192_s21 = sshll.u32 %s1496_s20, 4  ;;  %s1193_s21 = int_to_ptr.vmem [resolvable:$true] %s1192_s21 }
  0x2a   :  { %v1222_v51 = vcombine.low %v85_v40, %v99_v46  ;;  %v210_v52 = vsel %vm1582_vm8, %v1203_v42, %v209_v43  ;;  %v101_v53 = vshrl.u32 %v1591_v39, 16  ;;  %v104_v54 = vshll.u32 %v1591_v39, 16  ;;  %v1331_v38 = vld [vmem:[#allocation2 + $0x44] ss:$8 sps:$4 sm:$0xff]   ;;  %v1656_v46 = vld [vmem:[%s1904_s0 + $0x28] sm:$0xf]  ;;  %p1467_p11 = scmp.lt.s32.totalorder %s1193_s21, %s1193_s21 }
  0x2b   :  { %v257_v57 = vsel %vm1576_vm7, %v251_v48, %v256_v41  ;;  %v1226_v58 = vcombine.low %v206_v49, %v210_v52  ;;  %v110_v59 = vshll.u32 %v1600_v44, 16  ;;  %v115_v60 = vshrl.u32 %v1605_v45, 16  ;;  %680 = vmatpush1.bf16.msra.mxu0 %v1327_v10  ;;  %v1664_v49 = vld [vmem:[%s1904_s0 + $0x2c] sm:$0x3]  ;;  %s1462_s22 = scalar_lea.vmem %s1193_s21, 128 }
  0x2c   :  { %377 = vrot.lane.b32.xlu0 %v1222_v51, %s1494_s25  ;;  %v1230_v62 = vcombine.low %v247_v47, %v257_v57  ;;  %v103_v63 = vrot.slane %v101_v53, 4  ;;  %v106_v4 = vrot.slane %v104_v54, 5  ;;  %v118_v5 = vshll.u32 %v1605_v45, 16  ;;  %681 = vmatprep.subr.bf16.mxu0 %v1328_v15  ;;  %v1333_v57 = vld [vmem:[#allocation2 + $0x40] ss:$8 sps:$4 sm:$0xff]   ;;  %p1463_p10 = scmp.ne.s32.totalorder %s1193_s21, %s1462_s22  ;;  %p1468_p12 = scmp.lt.s32.totalorder %s1462_s22, %s1462_s22 }
  0x2d   :  { %v112_v6 = vrot.slane %v110_v59, 5  ;;  %v117_v7 = vrot.slane %v115_v60, 4  ;;  %v124_v8 = vshll.u32 %v1616_v50, 16  ;;  %v1204_v9 = vrot.slane %v1591_v39, 9  ;;  %v1336_v15 = vld [vmem:[#allocation2 + $0x30] ss:$8 sps:$4 sm:$0xff]  }
  0x2e   :  { %417 = vrot.lane.b32.xlu1 %v1230_v62, %s1495_s26  ;;  %v107_v11 = vor.u32 %v106_v4, %v103_v63  ;;  %v120_v12 = vrot.slane %v118_v5, 5  ;;  %v213_v13 = vrot.slane %v1600_v44, 5  ;;  %v1205_v14 = vrot.slane %v1605_v45, 9  ;;  %v1334_v62 = vld [vmem:[#allocation2 + $0x34] ss:$8 sps:$4 sm:$0xff]   ;;  %p1469_p13 = por %p1468_p12, %p1467_p11 }
  0x2f   :  { %v126_v16 = vrot.slane %v124_v8, 5  ;;  %v217_v17 = vrot.slane %v1616_v50, 5  ;;  %v258_v18 = vrot.slane %v101_v53, 5  ;;  %v259_v19 = vrot.slane %v104_v54, 6  ;;  %682 = vmatpush1.bf16.msra.mxu0 %v1330_v32 }
  0x30   :  { %397 = vrot.lane.b32.xlu0 %v1226_v58, %s1492_s7  ;;  %v108_v21 = vrot.slane %v107_v11, 4  ;;  %v121_v22 = vor.u32 %v120_v12, %v117_v7  ;;  %v214_v23 = vsel %vm1582_vm8, %v1204_v9, %v213_v13  ;;  %v262_v24 = vshrl.u32 %v1600_v44, 16  ;;  %683 = vmatprep.subr.bf16.mxu0 %v1331_v38  ;;  %p1470_p0 = pnand %p1469_p13, %p1463_p10 }
  0x31   :  { %v218_v27 = vsel %vm1582_vm8, %v1205_v14, %v217_v17  ;;  %v260_v28 = vor.u32 %v259_v19, %v258_v18  ;;  %v265_v29 = vrot.slane %v110_v59, 6  ;;  %v268_v30 = vrot.slane %v115_v60, 5 }
  0x32   :  { %v113_v34 = vsel %vm1570_vm6, %v108_v21, %v112_v6  ;;  %v122_v35 = vrot.slane %v121_v22, 4  ;;  %v1227_v36 = vcombine.low %v214_v23, %v218_v27  ;;  %v264_v37 = vrot.slane %v262_v24, 5  ;;  %v1337_v21 = vld [vmem:[#allocation2 + $0x24] ss:$8 sps:$4 sm:$0xff]  }
  0x33   :  { %v261_v40 = vrot.slane %v260_v28, 4  ;;  %v269_v41 = vrot.slane %v118_v5, 6  ;;  %v272_v42 = vshrl.u32 %v1616_v50, 16  ;;  %v275_v43 = vrot.slane %v124_v8, 6  ;;  %684 = vmatpush1.bf16.msra.mxu0 %v1333_v57  ;;  %v1686_v28 = vld [vmem:[%s1904_s0 + $0x30] sm:$0xf] }
  0x34   :  { %v127_v47 = vsel %vm1570_vm6, %v122_v35, %v126_v16  ;;  %399 = vrot.lane.b32.xlu0 %v1227_v36, %s1492_s7  ;;  %v266_v48 = vor.u32 %v265_v29, %v264_v37  ;;  %v129_v51 = vshrl.u32 %v1641_v25, 16  ;;  %v132_v52 = vshll.u32 %v1641_v25, 16  ;;  %685 = vmatprep.subr.bf16.mxu0 %v1334_v62  ;;  %v1697_v35 = vld [vmem:[%s1904_s0 + $0x34] sm:$0x3]  ;;  %v1702_v36 = vld [vmem:[%s1904_s0 + $0x38] sm:$0xf] }
  0x35   :  { %v1223_v53 = vcombine.low %v113_v34, %v127_v47  ;;  %v270_v54 = vor.u32 %v269_v41, %v268_v30  ;;  %v274_v55 = vrot.slane %v272_v42, 5  ;;  %v138_v56 = vshll.u32 %v1648_v31, 16  ;;  %v1339_v42 = vld [vmem:[#allocation2 + $0x20] ss:$8 sps:$4 sm:$0xff]  }
  0x36   :  { %v267_v58 = vsel %vm1576_vm7, %v261_v40, %v266_v48  ;;  %v131_v59 = vrot.slane %v129_v51, 4  ;;  %v134_v60 = vrot.slane %v132_v52, 5  ;;  %v143_v61 = vshrl.u32 %v1656_v46, 16 }
  0x37   :  { %379 = vrot.lane.b32.xlu1 %v1223_v53, %s1494_s25  ;;  %v271_v63 = vrot.slane %v270_v54, 4  ;;  %v276_v4 = vor.u32 %v275_v43, %v274_v55  ;;  %v140_v5 = vrot.slane %v138_v56, 5  ;;  %v146_v6 = vshll.u32 %v1656_v46, 16  ;;  %686 = vmatpush1.bf16.msra.mxu0 %v1336_v15 }
  0x38   :  { %v135_v7 = vor.u32 %v134_v60, %v131_v59  ;;  %v145_v8 = vrot.slane %v143_v61, 4  ;;  %v152_v9 = vshll.u32 %v1664_v49, 16  ;;  %v1206_v10 = vrot.slane %v1641_v25, 9  ;;  %687 = vmatprep.subr.bf16.mxu0 %v1337_v21 }
  0x39   :  { %v277_v11 = vsel %vm1576_vm7, %v271_v63, %v276_v4  ;;  %v148_v12 = vrot.slane %v146_v6, 5  ;;  %v221_v13 = vrot.slane %v1648_v31, 5  ;;  %v1207_v14 = vrot.slane %v1656_v46, 9 }
  0x3a   :  { %v1231_v16 = vcombine.low %v267_v58, %v277_v11  ;;  %v136_v17 = vrot.slane %v135_v7, 4  ;;  %v154_v18 = vrot.slane %v152_v9, 5  ;;  %v225_v19 = vrot.slane %v1664_v49, 5  ;;  %v1343_v11 = vld [vmem:[#allocation2 + $0x4] ss:$8 sps:$4 sm:$0xff]  }
  0x3b   :  { %v149_v22 = vor.u32 %v148_v12, %v145_v8  ;;  %v222_v23 = vsel %vm1582_vm8, %v1206_v10, %v221_v13  ;;  %v278_v24 = vrot.slane %v129_v51, 5  ;;  %v279_v27 = vrot.slane %v132_v52, 6  ;;  %v1340_v52 = vld [vmem:[#allocation2 + $0x14] ss:$8 sps:$4 sm:$0xff]   ;;  %688 = vmatpush1.bf16.msra.mxu0 %v1339_v42 }
  0x3c   :  { %419 = vrot.lane.b32.xlu1 %v1231_v16, %s1495_s26  ;;  %v141_v29 = vsel %vm1570_vm6, %v136_v17, %v140_v5  ;;  %v226_v30 = vsel %vm1582_vm8, %v1207_v14, %v225_v19  ;;  %v282_v32 = vshrl.u32 %v1648_v31, 16  ;;  %v285_v34 = vrot.slane %v138_v56, 6  ;;  %689 = vmatprep.subr.bf16.mxu0 %v1340_v52 }
  0x3d   :  { %v150_v37 = vrot.slane %v149_v22, 4  ;;  %v1228_v38 = vcombine.low %v222_v23, %v226_v30  ;;  %v280_v40 = vor.u32 %v279_v27, %v278_v24  ;;  %v288_v41 = vrot.slane %v143_v61, 5  ;;  %v1713_v61 = vld [vmem:[%s1904_s0 + $0x3c] sm:$0x3]  ;;  %v1345_v27 = vld [vmem:[#allocation2] ss:$8 sps:$4 sm:$0xff]  }
  0x3e   :  { %v284_v43 = vrot.slane %v282_v32, 5  ;;  %v289_v47 = vrot.slane %v146_v6, 6  ;;  %v292_v48 = vshrl.u32 %v1664_v49, 16  ;;  %v295_v51 = vrot.slane %v152_v9, 6  ;;  %v1342_v6 = vld [vmem:[#allocation2 + $0x10] ss:$8 sps:$4 sm:$0xff]  }
  0x3f   :  { %v155_v53 = vsel %vm1570_vm6, %v150_v37, %v154_v18  ;;  %v281_v54 = vrot.slane %v280_v40, 4  ;;  %v157_v55 = vshrl.u32 %v1686_v28, 16  ;;  %v160_v56 = vshll.u32 %v1686_v28, 16  ;;  %690 = vmatpush1.bf16.msra.mxu0 %v1342_v6  ;;  %v1346_v37 = vld [vmem:[#allocation2 + $0xf4] ss:$8 sps:$4 sm:$0xff]  }
  0x40   :  { %v1224_v57 = vcombine.low %v141_v29, %v155_v53  ;;  %401 = vrot.lane.b32.xlu1 %v1228_v38, %s1492_s7  ;;  %v286_v58 = vor.u32 %v285_v34, %v284_v43  ;;  %v290_v59 = vor.u32 %v289_v47, %v288_v41  ;;  %v294_v60 = vrot.slane %v292_v48, 5  ;;  %691 = vmatprep.subr.bf16.mxu0 %v1343_v11  ;;  %v1348_v43 = vld [vmem:[#allocation2 + $0xf0] ss:$8 sps:$4 sm:$0xff]   ;;  %v1349_v53 = vld [vmem:[#allocation2 + $0xe4] ss:$8 sps:$4 sm:$0xff]  }
  0x41   :  { %v159_v62 = vrot.slane %v157_v55, 4  ;;  %v162_v63 = vrot.slane %v160_v56, 5  ;;  %v166_v4 = vshll.u32 %v1697_v35, 16  ;;  %v171_v5 = vshrl.u32 %v1702_v36, 16  ;;  %v1351_v6 = vld [vmem:[#allocation2 + $0xe0] ss:$8 sps:$4 sm:$0xff]  }
  0x42   :  { %381 = vrot.lane.b32.xlu0 %v1224_v57, %s1494_s25  ;;  %v287_v7 = vsel %vm1576_vm7, %v281_v54, %v286_v58  ;;  %v291_v8 = vrot.slane %v290_v59, 4  ;;  %v296_v9 = vor.u32 %v295_v51, %v294_v60  ;;  %v174_v10 = vshll.u32 %v1702_v36, 16 }
  0x43   :  { %v163_v12 = vor.u32 %v162_v63, %v159_v62  ;;  %v168_v13 = vrot.slane %v166_v4, 5  ;;  %v173_v14 = vrot.slane %v171_v5, 4  ;;  %v180_v15 = vshll.u32 %v1713_v61, 16  ;;  %692 = vmatpush1.bf16.msra.mxu0 %v1345_v27 }
  0x44   :  { %v297_v16 = vsel %vm1576_vm7, %v291_v8, %v296_v9  ;;  %v176_v17 = vrot.slane %v174_v10, 5  ;;  %v1208_v18 = vrot.slane %v1686_v28, 9  ;;  %v229_v19 = vrot.slane %v1697_v35, 5  ;;  %693 = vmatprep.subr.bf16.mxu0 %v1346_v37  ;;  %v1357_v37 = vld [vmem:[#allocation2 + $0xc0] ss:$8 sps:$4 sm:$0xff]  }
  0x45   :  { %v1232_v21 = vcombine.low %v287_v7, %v297_v16  ;;  %v164_v22 = vrot.slane %v163_v12, 4  ;;  %v182_v23 = vrot.slane %v180_v15, 5  ;;  %v1209_v24 = vrot.slane %v1702_v36, 9  ;;  %v1352_v12 = vld [vmem:[#allocation2 + $0xd4] ss:$8 sps:$4 sm:$0xff]  }
  0x46   :  { %v177_v29 = vor.u32 %v176_v17, %v173_v14  ;;  %v230_v30 = vsel %vm1582_vm8, %v1208_v18, %v229_v19  ;;  %v233_v32 = vrot.slane %v1713_v61, 5  ;;  %v298_v34 = vrot.slane %v157_v55, 5  ;;  %v1354_v17 = vld [vmem:[#allocation2 + $0xd0] ss:$8 sps:$4 sm:$0xff]  }
  0x47   :  { %421 = vrot.lane.b32.xlu0 %v1232_v21, %s1495_s26  ;;  %v169_v38 = vsel %vm1570_vm6, %v164_v22, %v168_v13  ;;  %v299_v40 = vrot.slane %v160_v56, 6  ;;  %v302_v41 = vshrl.u32 %v1697_v35, 16  ;;  %v305_v42 = vrot.slane %v166_v4, 6  ;;  %694 = vmatpush2.bf16.msra.mxu0 %v1348_v43  ;;  %v1355_v22 = vld [vmem:[#allocation2 + $0xc4] ss:$8 sps:$4 sm:$0xff]  }
  0x48   :  { %v178_v47 = vrot.slane %v177_v29, 4  ;;  %v234_v48 = vsel %vm1582_vm8, %v1209_v24, %v233_v32  ;;  %v308_v51 = vrot.slane %v171_v5, 5  ;;  %v309_v52 = vrot.slane %v174_v10, 6  ;;  %695 = vmatprep.subr.bf16.mxu0 %v1349_v53  ;;  %v1363_v53 = vld [vmem:[#allocation2 + $0xa0] ss:$8 sps:$4 sm:$0xff]  }
  0x49   :  { %v1229_v54 = vcombine.low %v230_v30, %v234_v48  ;;  %v300_v55 = vor.u32 %v299_v40, %v298_v34  ;;  %v304_v57 = vrot.slane %v302_v41, 5  ;;  %v312_v58 = vshrl.u32 %v1713_v61, 16 }
  0x4a   :  { %v183_v56 = vsel %vm1570_vm6, %v178_v47, %v182_v23  ;;  %v310_v59 = vor.u32 %v309_v52, %v308_v51  ;;  %v315_v60 = vrot.slane %v180_v15, 6  ;;  %v1218_v62 = vcombine.low %v1543_v0, %v1553_v2  ;;  %v1360_v51 = vld [vmem:[#allocation2 + $0xb0] ss:$8 sps:$4 sm:$0xff]   ;;  %v1361_v52 = vld [vmem:[#allocation2 + $0xa4] ss:$8 sps:$4 sm:$0xff]  }
  0x4b   :  { %v1225_v33 = vcombine.low %v169_v38, %v183_v56  ;;  %403 = vrot.lane.b32.xlu0 %v1229_v54, %s1492_s7  ;;  %v301_v63 = vrot.slane %v300_v55, 4  ;;  %v306_v4 = vor.u32 %v305_v42, %v304_v57  ;;  %v314_v5 = vrot.slane %v312_v58, 5  ;;  %696 = vmatpush2.bf16.msra.mxu0 %v1351_v6  ;;  %v1358_v42 = vld [vmem:[#allocation2 + $0xb4] ss:$8 sps:$4 sm:$0xff]   ;;  %v1368_v54 = vld [vmem:[#allocation2 + $0x84] ss:$8 sps:$4 sm:$0xff]  }
  0x4c   :  { %v311_v7 = vrot.slane %v310_v59, 4  ;;  %vm437_vm9 = vcmask 261120   ;;  %vm318_vm10 = vcmask 1041408   ;;  %vm319_vm11 = vcmask 1045508   ;;  %697 = vmatprep.subr.bf16.mxu0 %v1352_v12  ;;  %v1370_v55 = vld [vmem:[#allocation2 + $0x80] ss:$8 sps:$4 sm:$0xff]  }
  0x4d   :  { %383 = vrot.lane.b32.xlu1 %v1225_v33, %s1494_s25  ;;  %v307_v20 = vsel %vm1576_vm7, %v301_v63, %v306_v4  ;;  %v316_v8 = vor.u32 %v315_v60, %v314_v5  ;;  %vm1745_vm12 = vmor %vm318_vm10, %vm319_vm11  ;;  %v1210_v10 = vrot.slane %v1543_v0, 10  ;;  %v323_v11 = vrot.slane %v1548_v1, 6 }
  0x4e   :  { %v1211_v13 = vrot.slane %v1553_v2, 10  ;;  %v327_v14 = vrot.slane %v1558_v3, 6  ;;  %v1219_v15 = vcombine.low %v1591_v39, %v1605_v45  ;;  %v1212_v19 = vrot.slane %v1591_v39, 10 }
  0x4f   :  { %v317_v16 = vsel %vm1576_vm7, %v311_v7, %v316_v8  ;;  %v324_v18 = vsel %vm1745_vm12, %v1210_v10, %v323_v11  ;;  %v331_v1 = vrot.slane %v1600_v44, 6  ;;  %v1213_v3 = vrot.slane %v1605_v45, 10  ;;  %698 = vmatpush2.bf16.msra.mxu0 %v1354_v17  ;;  %v1376_v17 = vld [vmem:[#allocation5 + $0x70] sm:$0xff]  }
  0x50   :  { %v1233_v21 = vcombine.low %v307_v20, %v317_v16  ;;  %v328_v23 = vsel %vm1745_vm12, %v1211_v13, %v327_v14  ;;  %v335_v24 = vrot.slane %v1616_v50, 6  ;;  %v1220_v29 = vcombine.low %v1641_v25, %v1656_v46  ;;  %699 = vmatprep.subr.bf16.mxu0 %v1355_v22  ;;  %v1375_v16 = vld [vmem:[#allocation5 + $0x38] sm:$0xff]   ;;  %v1381_v22 = vld [vmem:[#allocation5 + $0x20] sm:$0xff]  }
  0x51   :  { %v1234_v26 = vcombine.low %v324_v18, %v328_v23  ;;  %v332_v27 = vsel %vm1745_vm12, %v1212_v19, %v331_v1  ;;  %v1214_v30 = vrot.slane %v1641_v25, 10  ;;  %v339_v32 = vrot.slane %v1648_v31, 6  ;;  %v1377_v18 = vld [vmem:[#allocation5 + $0x30] sm:$0xff]   ;;  %v1378_v19 = vld [vmem:[#allocation5 + $0x68] sm:$0xff]   ;;  %v1382_v23 = vld [vmem:[#allocation5 + $0x58] sm:$0xff]  }
  0x52   :  { %423 = vrot.lane.b32.xlu1 %v1233_v21, %s1495_s26  ;;  %v336_v44 = vsel %vm1745_vm12, %v1213_v3, %v335_v24  ;;  %v1215_v50 = vrot.slane %v1656_v46, 10  ;;  %v343_v34 = vrot.slane %v1664_v49, 6  ;;  %v1221_v40 = vcombine.low %v1686_v28, %v1702_v36  ;;  %v1379_v1 = vld [vmem:[#allocation5 + $0x28] sm:$0xff]   ;;  %v1380_v21 = vld [vmem:[#allocation5 + $0x60] sm:$0xff]   ;;  %v1383_v3 = vld [vmem:[#allocation5 + $0x18] sm:$0xff]  }
  0x53   :  { %1270 = vmatprep.mubr.msk.bf16.mxu0 %vm437_vm9, %v1234_v26  ;;  %v1235_v38 = vcombine.low %v332_v27, %v336_v44  ;;  %v1216_v25 = vrot.slane %v1686_v28, 10  ;;  %v347_v41 = vrot.slane %v1697_v35, 6  ;;  %v340_v43 = vsel %vm1745_vm12, %v1214_v30, %v339_v32  ;;  %700 = vmatpush2.bf16.msra.mxu0 %v1357_v37  ;;  %v1384_v24 = vld [vmem:[#allocation5 + $0x50] sm:$0xff]   ;;  %v1386_v27 = vld [vmem:[#allocation5 + $0x48] sm:$0xff]   ;;  %v1388_v30 = vld [vmem:[#allocation5 + $0x40] sm:$0xff]  }
  0x54   :  { %v344_v31 = vsel %vm1745_vm12, %v1215_v50, %v343_v34  ;;  %v1217_v46 = vrot.slane %v1702_v36, 10  ;;  %v351_v49 = vrot.slane %v1713_v61, 6  ;;  %701 = vmatprep.subr.bf16.mxu0 %v1358_v42  ;;  %v1364_v36 = vld [vmem:[#allocation2 + $0x94] ss:$8 sps:$4 sm:$0xff]   ;;  %v1366_v61 = vld [vmem:[#allocation2 + $0x90] ss:$8 sps:$4 sm:$0xff]   ;;  %v750_v32 = vlaneseq }
  0x55   :  { %v1236_v47 = vcombine.low %v340_v43, %v344_v31  ;;  %v348_v48 = vsel %vm1745_vm12, %v1216_v25, %v347_v41  ;;  %vm450_vm13 = vcmask 523264   ;;  %vm459_vm14 = vcmask 785408   ;;  %v1385_v26 = vld [vmem:[#allocation5 + $0x10] sm:$0xff]   ;;  %v1389_v44 = vld [vmem:[#allocation5] sm:$0xff]  }
  0x56   :  { %v352_v28 = vsel %vm1745_vm12, %v1217_v46, %v351_v49  ;;  %v751_v50 = vshrl.u32 %v750_v32, 7  ;;  %v752_v37 = vld [vmem:[%s1907_s3] sm:$0x3]  ;;  %vm1011_vm1 = vcmask 1041409   ;;  %vm1014_vm2 = vcmask 1042434  }
  0x57   :  { %v1237_v35 = vcombine.low %v348_v48, %v352_v28  ;;  %702 = vmatpush2.bf16.msra.mxu0 %v1360_v51  ;;  %vm1017_vm3 = vcmask 1043459   ;;  %vm1020_vm4 = vcmask 1044484   ;;  %vm1023_vm5 = vcmask 1045509  }
  0x58   :  { %703 = vmatprep.subr.bf16.mxu0 %v1361_v52  ;;  %v755_v34 = vsub.s32 0, %v751_v50  ;;  %vm1026_vm6 = vcmask 1046534   ;;  %vm1029_vm7 = vcmask 1047559  }
  0x5b   :  { %704 = vmatpush2.bf16.msra.mxu0 %v1363_v53 }
  0x5c   :  { %705 = vmatprep.subr.bf16.mxu0 %v1364_v36 }
  0x5f   :  { %706 = vmatpush2.bf16.msra.mxu0 %v1366_v61 }
  0x60   :  { %707 = vmatprep.subr.bf16.mxu0 %v1368_v54 }
  0x63   :  { %708 = vmatpush2.bf16.msra.mxu0 %v1370_v55 }
  0x9e   :  { %v378_v57 = vpop.permute.xlu0 %377 }
  0x9f   :  { %v440_v58 = vsel %vm437_vm9, %v1218_v62, %v378_v57 }
  0xa0   :  { %v418_v59 = vpop.permute.xlu1 %417 }
  0xa2   :  { %v398_v56 = vpop.permute.xlu0 %397 }
  0xa3   :  { %v452_v60 = vsel %vm450_vm13, %v440_v58, %v398_v56 }
  0xa4   :  { %v461_v33 = vsel %vm459_vm14, %v452_v60, %v418_v59 }
  0xa5   :  { %710 = vmatmul.mubr.bf16.vlgmr.msra.gmra.mxu0 %v461_v33 }
  0xa6   :  { %1271 = vmatprep.mubr.msk.bf16.mxu0 %vm437_vm9, %v1235_v38  ;;  %v400_v4 = vpop.permute.xlu0 %399  ;;  %v759_v38 = vsub.s32 1, %v751_v50 }
  0xa8   :  { %v760_v25 = vrot.slane %v752_v37, %v759_v38 }
  0xa9   :  { %v380_v63 = vpop.permute.xlu1 %379 }
  0xaa   :  { %v443_v5 = vsel %vm437_vm9, %v1219_v15, %v380_v63  ;;  %v1374_v15 = vld [vmem:[#allocation5 + $0x78] sm:$0xff]   ;;  %vm1819_vm0 = vcmp.lt.s32.totalorder %v751_v50, %v760_v25 }
  0xab   :  { %v454_v0 = vsel %vm450_vm13, %v443_v5, %v400_v4  ;;  %1291 = vmatprep.subr.bf16.mxu1 %v1374_v15 }
  0xac   :  { %1292 = vmatpush3.bf16.msra.mxu1 %v1375_v16 }
  0xad   :  { %1293 = vmatprep.subr.bf16.mxu1 %v1376_v17 }
  0xae   :  { %v420_v2 = vpop.permute.xlu1 %419 }
  0xaf   :  { %v464_v62 = vsel %vm459_vm14, %v454_v0, %v420_v2 }
  0xb0   :  { %720 = vmatmul.mubr.bf16.gmra.mxu0 %v464_v62  ;;  %1294 = vmatpush3.bf16.msra.mxu1 %v1377_v18 }
  0xb1   :  { %1272 = vmatprep.mubr.msk.bf16.mxu0 %vm437_vm9, %v1236_v47  ;;  %1295 = vmatprep.subr.bf16.mxu1 %v1378_v19 }
  0xb2   :  { %v402_v7 = vpop.permute.xlu1 %401 }
  0xb4   :  { %v382_v6 = vpop.permute.xlu0 %381  ;;  %1296 = vmatpush3.bf16.msra.mxu1 %v1379_v1 }
  0xb5   :  { %v446_v20 = vsel %vm437_vm9, %v1220_v29, %v382_v6  ;;  %1297 = vmatprep.subr.bf16.mxu1 %v1380_v21  ;;  %v1387_v29 = vld [vmem:[#allocation5 + $0x8] sm:$0xff]  }
  0xb6   :  { %v456_v8 = vsel %vm450_vm13, %v446_v20, %v402_v7 }
  0xb8   :  { %1298 = vmatpush3.bf16.msra.mxu1 %v1381_v22 }
  0xb9   :  { %v422_v9 = vpop.permute.xlu0 %421  ;;  %1299 = vmatprep.subr.bf16.mxu1 %v1382_v23 }
  0xba   :  { %v467_v10 = vsel %vm459_vm14, %v456_v8, %v422_v9 }
  0xbb   :  { %730 = vmatmul.mubr.bf16.gmra.mxu0 %v467_v10  ;;  %v879_v10 = vld [vmem:[%s1906_s2] sm:$0x3] }
  0xbc   :  { %1273 = vmatprep.mubr.msk.bf16.mxu0 %vm437_vm9, %v1237_v35  ;;  %1300 = vmatpush3.bf16.msra.mxu1 %v1383_v3  ;;  %v1842_v19 = vrot.slane %v879_v10, %v755_v34 }
  0xbd   :  { %v404_v45 = vpop.permute.xlu0 %403  ;;  %1301 = vmatprep.subr.bf16.mxu1 %v1384_v24 }
  0xbf   :  { %v384_v39 = vpop.permute.xlu1 %383 }
  0xc0   :  { %v449_v11 = vsel %vm437_vm9, %v1221_v40, %v384_v39  ;;  %1302 = vmatpush3.bf16.msra.mxu1 %v1385_v26  ;;  %v756_v40 = vrot.slane %v752_v37, %v755_v34  ;;  %v1844_v26 = vrot.slane %v879_v10, %v759_v38 }
  0xc1   :  { %v458_v12 = vsel %vm450_vm13, %v449_v11, %v404_v45  ;;  %1303 = vmatprep.subr.bf16.mxu1 %v1386_v27 }
  0xc2   :  { %vm1815_vm15 = vcmp.lt.s32.totalorder %v751_v50, %v756_v40 }
  0xc4   :  { %v424_v13 = vpop.permute.xlu1 %423  ;;  %1304 = vmatpush3.bf16.msra.mxu1 %v1387_v29 }
  0xc5   :  { %v470_v14 = vsel %vm459_vm14, %v458_v12, %v424_v13  ;;  %1305 = vmatprep.subr.bf16.mxu1 %v1388_v30 }
  0xc6   :  { %740 = vmatmul.mubr.bf16.gmra.mxu0 %v470_v14 }
  0xc8   :  { %1306 = vmatpush3.bf16.msra.mxu1 %v1389_v44 }
 0x165   :  { %v711_v42 = vpop.f32.mrf.mxu0 }
 0x166   :  { %v767_v31 = vsel %vm1815_vm15, %v711_v42, -1e+30 }
 0x167   :  { %v783_v46 = vrot.slane %v767_v31, 4  ;;  %v713_v49 = vpop.f32.mrf.mxu0 }
 0x168   :  { %v768_v47 = vsel %vm1819_vm0, %v713_v49, -1e+30 }
 0x169   :  { %v789_v48 = vrot.slane %v768_v47, 4  ;;  %v715_v28 = vpop.f32.mrf.mxu0  ;;  %v784_v35 = vmax.f32 %v767_v31, %v783_v46 }
 0x16a   :  { %v769_v51 = vsel %vm1815_vm15, %v715_v28, -1e+30 }
 0x16b   :  { %v717_v52 = vpop.f32.mrf.mxu0  ;;  %v790_v53 = vmax.f32 %v768_v47, %v789_v48  ;;  %v795_v61 = vrot.slane %v769_v51, 4  ;;  %v785_v54 = vrot.slane %v784_v35, 2 }
 0x16c   :  { %v770_v36 = vsel %vm1819_vm0, %v717_v52, -1e+30 }
 0x16d   :  { %v801_v55 = vrot.slane %v770_v36, 4  ;;  %v791_v57 = vrot.slane %v790_v53, 2  ;;  %v796_v56 = vmax.f32 %v769_v51, %v795_v61  ;;  %v786_v59 = vmax.f32 %v784_v35, %v785_v54 }
 0x16f   :  { %v802_v63 = vmax.f32 %v770_v36, %v801_v55  ;;  %v792_v4 = vmax.f32 %v790_v53, %v791_v57  ;;  %v797_v62 = vrot.slane %v796_v56, 2  ;;  %v787_v6 = vrot.slane %v786_v59, 1 }
 0x170   :  { %v721_v58 = vpop.f32.mrf.mxu0 }
 0x171   :  { %v771_v60 = vsel %vm1815_vm15, %v721_v58, -1e+30  ;;  %v803_v39 = vrot.slane %v802_v63, 2  ;;  %v793_v11 = vrot.slane %v792_v4, 1  ;;  %v798_v15 = vmax.f32 %v796_v56, %v797_v62 }
 0x172   :  { %v723_v33 = vpop.f32.mrf.mxu0  ;;  %v807_v5 = vrot.slane %v771_v60, 4  ;;  %v788_v18 = vmax.f32 %v786_v59, %v787_v6 }
 0x173   :  { %v772_v0 = vsel %vm1819_vm0, %v723_v33, -1e+30  ;;  %v804_v21 = vmax.f32 %v802_v63, %v803_v39  ;;  %v794_v24 = vmax.f32 %v792_v4, %v793_v11  ;;  %v799_v30 = vrot.slane %v798_v15, 1 }
 0x174   :  { %v725_v2 = vpop.f32.mrf.mxu0  ;;  %v808_v7 = vmax.f32 %v771_v60, %v807_v5  ;;  %v813_v20 = vrot.slane %v772_v0, 4  ;;  %v891_v37 = vadd.f32 %v1842_v19, %v788_v18 }
 0x175   :  { %v773_v8 = vsel %vm1815_vm15, %v725_v2, -1e+30  ;;  %v805_v25 = vrot.slane %v804_v21, 1  ;;  %v892_v49 = vadd.f32 %v1844_v26, %v794_v24  ;;  %v800_v28 = vmax.f32 %v798_v15, %v799_v30 }
 0x176   :  { %v727_v9 = vpop.f32.mrf.mxu0  ;;  %v819_v45 = vrot.slane %v773_v8, 4  ;;  %v809_v12 = vrot.slane %v808_v7, 2  ;;  %v814_v13 = vmax.f32 %v772_v0, %v813_v20  ;;  %1390 = vtanh.f32 %v891_v37 }
 0x177   :  { %v774_v14 = vsel %vm1819_vm0, %v727_v9, -1e+30  ;;  %v806_v55 = vmax.f32 %v804_v21, %v805_v25  ;;  %1392 = vtanh.f32 %v892_v49  ;;  %v893_v63 = vadd.f32 %v1842_v19, %v800_v28 }
 0x178   :  { %v820_v16 = vmax.f32 %v773_v8, %v819_v45  ;;  %v825_v17 = vrot.slane %v774_v14, 4  ;;  %v815_v1 = vrot.slane %v814_v13, 2  ;;  %v810_v22 = vmax.f32 %v808_v7, %v809_v12 }
 0x179   :  { %v894_v7 = vadd.f32 %v1844_v26, %v806_v55  ;;  %1394 = vtanh.f32 %v893_v63 }
 0x17a   :  { %v826_v23 = vmax.f32 %v774_v14, %v825_v17  ;;  %v821_v27 = vrot.slane %v820_v16, 2  ;;  %v816_v44 = vmax.f32 %v814_v13, %v815_v1  ;;  %v811_v42 = vrot.slane %v810_v22, 1 }
 0x17b   :  { %v731_v3 = vpop.f32.mrf.mxu0  ;;  %1396 = vtanh.f32 %v894_v7 }
 0x17c   :  { %v775_v29 = vsel %vm1815_vm15, %v731_v3, -1e+30  ;;  %v827_v34 = vrot.slane %v826_v23, 2  ;;  %v822_v47 = vmax.f32 %v820_v16, %v821_v27  ;;  %v817_v35 = vrot.slane %v816_v44, 1 }
 0x17d   :  { %v831_v32 = vrot.slane %v775_v29, 4  ;;  %v733_v50 = vpop.f32.mrf.mxu0  ;;  %v812_v57 = vmax.f32 %v810_v22, %v811_v42 }
 0x17e   :  { %v776_v40 = vsel %vm1819_vm0, %v733_v50, -1e+30  ;;  %v828_v36 = vmax.f32 %v826_v23, %v827_v34  ;;  %v823_v56 = vrot.slane %v822_v47, 1  ;;  %v818_v4 = vmax.f32 %v816_v44, %v817_v35 }
 0x17f   :  { %v832_v31 = vmax.f32 %v775_v29, %v831_v32  ;;  %v837_v46 = vrot.slane %v776_v40, 4  ;;  %v735_v38 = vpop.f32.mrf.mxu0  ;;  %v895_v20 = vadd.f32 %v1842_v19, %v812_v57 }
 0x180   :  { %v777_v48 = vsel %vm1815_vm15, %v735_v38, -1e+30  ;;  %v829_v5 = vrot.slane %v828_v36, 1  ;;  %v824_v10 = vmax.f32 %v822_v47, %v823_v56  ;;  %v896_v15 = vadd.f32 %v1844_v26, %v818_v4 }
 0x181   :  { %v833_v51 = vrot.slane %v832_v31, 2  ;;  %v838_v52 = vmax.f32 %v776_v40, %v837_v46  ;;  %v737_v53 = vpop.f32.mrf.mxu0  ;;  %v843_v61 = vrot.slane %v777_v48, 4  ;;  %1398 = vtanh.f32 %v895_v20 }
 0x182   :  { %v778_v54 = vsel %vm1819_vm0, %v737_v53, -1e+30  ;;  %v830_v16 = vmax.f32 %v828_v36, %v829_v5  ;;  %v897_v3 = vadd.f32 %v1842_v19, %v824_v10  ;;  %1400 = vtanh.f32 %v896_v15 }
 0x183   :  { %v834_v58 = vmax.f32 %v832_v31, %v833_v51  ;;  %v839_v59 = vrot.slane %v838_v52, 2  ;;  %v844_v60 = vmax.f32 %v777_v48, %v843_v61  ;;  %v849_v33 = vrot.slane %v778_v54, 4  ;;  %v1871_v38 = vpop.eup %1390 }
 0x184   :  { %v898_v37 = vadd.f32 %v1844_v26, %v830_v16  ;;  %1402 = vtanh.f32 %v897_v3  ;;  %v1875_v51 = vpop.eup %1392  ;;  %v923_v16 = vpack.c.bf16 %v1871_v38, %v1871_v38 }
 0x185   :  { %v840_v0 = vmax.f32 %v838_v52, %v839_v59  ;;  %v845_v2 = vrot.slane %v844_v60, 2  ;;  %v850_v62 = vmax.f32 %v778_v54, %v849_v33  ;;  %v835_v8 = vrot.slane %v834_v58, 1 }
 0x186   :  { %v741_v6 = vpop.f32.mrf.mxu0  ;;  %1404 = vtanh.f32 %v898_v37 }
 0x187   :  { %v779_v9 = vsel %vm1815_vm15, %v741_v6, -1e+30  ;;  %v841_v39 = vrot.slane %v840_v0, 1  ;;  %v846_v45 = vmax.f32 %v844_v60, %v845_v2  ;;  %v851_v11 = vrot.slane %v850_v62, 2 }
 0x188   :  { %v743_v12 = vpop.f32.mrf.mxu0  ;;  %v855_v13 = vrot.slane %v779_v9, 4  ;;  %v836_v21 = vmax.f32 %v834_v58, %v835_v8  ;;  %v1395_v58 = vpop.eup %1394 }
 0x189   :  { %v780_v14 = vsel %vm1819_vm0, %v743_v12, -1e+30  ;;  %v847_v17 = vrot.slane %v846_v45, 1  ;;  %v852_v18 = vmax.f32 %v850_v62, %v851_v11  ;;  %v842_v24 = vmax.f32 %v840_v0, %v841_v39  ;;  %v1397_v33 = vpop.eup %1396 }
 0x18a   :  { %v745_v1 = vpop.f32.mrf.mxu0  ;;  %v856_v22 = vmax.f32 %v779_v9, %v855_v13  ;;  %v861_v23 = vrot.slane %v780_v14, 4  ;;  %v899_v25 = vadd.f32 %v1842_v19, %v836_v21  ;;  %v925_v39 = vpack.c.bf16 %v1395_v58, %v1395_v58 }
 0x18b   :  { %v853_v27 = vrot.slane %v852_v18, 1  ;;  %v848_v30 = vmax.f32 %v846_v45, %v847_v17  ;;  %v781_v50 = vsel %vm1815_vm15, %v745_v1, -1e+30  ;;  %v900_v49 = vadd.f32 %v1844_v26, %v842_v24 }
 0x18c   :  { %v747_v29 = vpop.f32.mrf.mxu0  ;;  %v857_v44 = vrot.slane %v856_v22, 2  ;;  %v862_v32 = vmax.f32 %v780_v14, %v861_v23  ;;  %v867_v40 = vrot.slane %v781_v50, 4  ;;  %1406 = vtanh.f32 %v899_v25 }
 0x18d   :  { %v854_v34 = vmax.f32 %v852_v18, %v853_v27  ;;  %v782_v46 = vsel %vm1819_vm0, %v747_v29, -1e+30  ;;  %v901_v41 = vadd.f32 %v1842_v19, %v848_v30  ;;  %1408 = vtanh.f32 %v900_v49 }
 0x18e   :  { %v858_v42 = vmax.f32 %v856_v22, %v857_v44  ;;  %v863_v31 = vrot.slane %v862_v32, 2  ;;  %v868_v47 = vmax.f32 %v781_v50, %v867_v40  ;;  %v873_v35 = vrot.slane %v782_v46, 4  ;;  %v1399_v5 = vpop.eup %1398 }
 0x18f   :  { %v902_v52 = vadd.f32 %v1844_v26, %v854_v34  ;;  %1410 = vtanh.f32 %v901_v41  ;;  %v1401_v62 = vpop.eup %1400  ;;  %v926_v45 = vpack.c.bf16 %v1397_v33, %v1397_v33  ;;  %v927_v12 = vpack.c.bf16 %v1399_v5, %v1399_v5 }
 0x190   :  { %v859_v48 = vrot.slane %v858_v42, 1  ;;  %v864_v28 = vmax.f32 %v862_v32, %v863_v31  ;;  %v869_v53 = vrot.slane %v868_v47, 2  ;;  %v874_v61 = vmax.f32 %v782_v46, %v873_v35 }
 0x191   :  { %1412 = vtanh.f32 %v902_v52  ;;  %v1403_v7 = vpop.eup %1402  ;;  %v928_v14 = vpack.c.bf16 %v1401_v62, %v1401_v62  ;;  %v997_v1 = vunpack.c.l.b16 %v926_v45  ;;  %v998_v3 = vunpack.c.l.b16 %v927_v12 }
 0x192   :  { %v860_v43 = vmax.f32 %v858_v42, %v859_v48  ;;  %v865_v36 = vrot.slane %v864_v28, 1  ;;  %v870_v54 = vmax.f32 %v868_v47, %v869_v53  ;;  %v875_v59 = vrot.slane %v874_v61, 2 }
 0x193   :  { %v1405_v8 = vpop.eup %1404  ;;  %v929_v15 = vpack.c.bf16 %v1403_v7, %v1403_v7  ;;  %v924_v29 = vpack.c.bf16 %v1875_v51, %v1875_v51  ;;  %v999_v30 = vunpack.c.l.b16 %v928_v14  ;;  %v994_v50 = vunpack.c.l.b16 %v923_v16  ;;  %v1274_v14 = vld [vmem:[%s1909_s5] ss:$0 sm:$0xff] }
 0x194   :  { %v903_v55 = vadd.f32 %v1842_v19, %v860_v43  ;;  %v866_v57 = vmax.f32 %v864_v28, %v865_v36  ;;  %v871_v56 = vrot.slane %v870_v54, 1  ;;  %v876_v4 = vmax.f32 %v874_v61, %v875_v59 }
 0x195   :  { %v930_v17 = vpack.c.bf16 %v1405_v8, %v1405_v8  ;;  %v1000_v44 = vunpack.c.l.b16 %v929_v15  ;;  %v1031_v42 = vrot.slane %v997_v1, 7  ;;  %v1013_v38 = vrot.slane %v998_v3, 6 }
 0x196   :  { %1414 = vtanh.f32 %v903_v55  ;;  %v904_v60 = vadd.f32 %v1844_v26, %v866_v57  ;;  %v872_v63 = vmax.f32 %v870_v54, %v871_v56  ;;  %v877_v2 = vrot.slane %v876_v4, 1 }
 0x197   :  { %v1001_v37 = vunpack.c.l.b16 %v930_v17  ;;  %v995_v48 = vunpack.c.l.b16 %v924_v29  ;;  %v1033_v28 = vrot.slane %v999_v30, 6  ;;  %v1016_v35 = vrot.slane %v1000_v44, 5 }
 0x198   :  { %1416 = vtanh.f32 %v904_v60  ;;  %v905_v0 = vadd.f32 %v1842_v19, %v872_v63  ;;  %v878_v6 = vmax.f32 %v876_v4, %v877_v2 }
 0x199   :  { %v1407_v9 = vpop.eup %1406  ;;  %v1035_v52 = vrot.slane %v1001_v37, 5  ;;  %v1032_v54 = vsel %vm1011_vm1, %v1031_v42, %v995_v48 }
 0x19a   :  { %1418 = vtanh.f32 %v905_v0  ;;  %v906_v20 = vadd.f32 %v1844_v26, %v878_v6  ;;  %v1409_v10 = vpop.eup %1408  ;;  %v931_v18 = vpack.c.bf16 %v1407_v9, %v1407_v9  ;;  %v996_v26 = vunpack.c.l.b16 %v925_v39 }
 0x19b   :  { %v932_v21 = vpack.c.bf16 %v1409_v10, %v1409_v10  ;;  %v1034_v33 = vsel %vm1014_vm2, %v1033_v28, %v1032_v54 }
 0x19c   :  { %1420 = vtanh.f32 %v906_v20  ;;  %v1411_v11 = vpop.eup %1410  ;;  %v1002_v34 = vunpack.c.l.b16 %v931_v18  ;;  %v1010_v25 = vrot.slane %v996_v26, 7  ;;  %v1036_v2 = vsel %vm1017_vm3, %v1035_v52, %v1034_v33 }
 0x19d   :  { %v933_v22 = vpack.c.bf16 %v1411_v11, %v1411_v11  ;;  %v1003_v46 = vunpack.c.l.b16 %v932_v21 }
 0x19e   :  { %v1413_v13 = vpop.eup %1412  ;;  %v1019_v53 = vrot.slane %v1002_v34, 4  ;;  %v1012_v57 = vsel %vm1011_vm1, %v1010_v25, %v994_v50 }
 0x19f   :  { %v934_v27 = vpack.c.bf16 %v1413_v13, %v1413_v13  ;;  %v1004_v31 = vunpack.c.l.b16 %v933_v22  ;;  %v1037_v55 = vrot.slane %v1003_v46, 4  ;;  %v1015_v59 = vsel %vm1014_vm2, %v1013_v38, %v1012_v57 }
 0x1a0   :  { %v1018_v4 = vsel %vm1017_vm3, %v1016_v35, %v1015_v59 }
 0x1a1   :  { %v1005_v49 = vunpack.c.l.b16 %v934_v27  ;;  %v1022_v61 = vrot.slane %v1004_v31, 3  ;;  %v1021_v62 = vsel %vm1020_vm4, %v1019_v53, %v1018_v4  ;;  %v1038_v6 = vsel %vm1020_vm4, %v1037_v55, %v1036_v2 }
 0x1a3   :  { %v1415_v19 = vpop.eup %1414  ;;  %v1039_v56 = vrot.slane %v1005_v49, 3  ;;  %v1024_v7 = vsel %vm1023_vm5, %v1022_v61, %v1021_v62 }
 0x1a4   :  { %v935_v24 = vpack.c.bf16 %v1415_v19, %v1415_v19 }
 0x1a5   :  { %v1417_v23 = vpop.eup %1416  ;;  %v1040_v20 = vsel %vm1023_vm5, %v1039_v56, %v1038_v6 }
 0x1a6   :  { %v936_v32 = vpack.c.bf16 %v1417_v23, %v1417_v23  ;;  %v1006_v41 = vunpack.c.l.b16 %v935_v24 }
 0x1a7   :  { %v1419_v40 = vpop.eup %1418 }
 0x1a8   :  { %v937_v47 = vpack.c.bf16 %v1419_v40, %v1419_v40  ;;  %v1007_v51 = vunpack.c.l.b16 %v936_v32  ;;  %v1025_v60 = vrot.slane %v1006_v41, 2 }
 0x1a9   :  { %v1421_v36 = vpop.eup %1420 }
 0x1aa   :  { %v1008_v43 = vunpack.c.l.b16 %v937_v47  ;;  %v938_v58 = vpack.c.bf16 %v1421_v36, %v1421_v36  ;;  %v1041_v63 = vrot.slane %v1007_v51, 2  ;;  %v1027_v9 = vsel %vm1026_vm6, %v1025_v60, %v1024_v7 }
 0x1ac   :  { %v1028_v5 = vrot.slane %v1008_v43, 1  ;;  %v1009_v0 = vunpack.c.l.b16 %v938_v58  ;;  %v1042_v10 = vsel %vm1026_vm6, %v1041_v63, %v1040_v20 }
 0x1ae   :  { %v1043_v8 = vrot.slane %v1009_v0, 1  ;;  %v1030_v39 = vsel %vm1029_vm7, %v1028_v5, %v1027_v9 }
 0x1af   :  { %v1045_v12 = vpack.c.b16 %v1030_v39, %v1030_v39 }
 0x1b0   :  { %v1044_v45 = vsel %vm1029_vm7, %v1043_v8, %v1042_v10 }
 0x1b1   :  { %v1046_v11 = vpack.c.b16 %v1044_v45, %v1044_v45 }
 0x1b3   :  { %1177 = vmatprep.mubr.bf16.mxu1 %v1046_v11 }
 0x1b4   :  { %1178 = vmatmul.mubr.bf16.vlgmr.msra.gmra.mxu1 %v1045_v12 }
 0x274   :  { %v1307_v13 = vpop.f32.mrf.mxu1 }
 0x276   :  { %v1308_v15 = vpop.f32.mrf.mxu1 }
 0x277   :  { %v1309_v19 = vadd.f32 %v1308_v15, %v1307_v13 }
 0x278   :  { %v1310_v16 = vpop.f32.mrf.mxu1 }
 0x279   :  { %v1180_v17 = vadd.f32 %v1309_v19, %v1274_v14 }
 0x27a   :  { %v1311_v18 = vpop.f32.mrf.mxu1 }
 0x27b   :  { %1185 = vst [vmem:[#allocation7] sm:$0xff] %v1180_v17 }
 0x27c   :  { %1473 = shalt.err (!%p1470_p0)
}
 0x27d   :  { %1195 = dma.vmem_to_hbm [thread:$0]  %s1193_s21, 128, %s1910_s6, [#allocation4]  }
 0x27e   :  { %1486 = dma.done.wait [#allocation4], 128  }
 0x27f   :  { %1487 = vsyncadd [#allocation4], 4294967168 }
 0x280   :  { %1199 = vsyncpa [#allocation3], 1 }
 0x281   :  { %1200 = vsyncpa [#allocation6], 1 }
 0x282   :  { %1201 = vsyncpa [#allocation4], 1 }

</bundles_post_ra>
